<compile_context>
chip_gen: v7x
topology: tpu7x:2x2x1
jax: 0.10.0
libtpu: 0.0.40
codegen_flags: <defaults>
</compile_context>

<pallas_src>
import functools

import jax
import jax.numpy as jnp
from jax import lax
from jax.experimental import pallas as pl
from jax.experimental.pallas import tpu as pltpu


# ---------------------------------------------------------------------------
# Kernel
# ---------------------------------------------------------------------------
def _pool_mul_kernel(x_ref, init_ref, o_ref, *, r, w, hr):
    """Blocks are (B, S, L) with L = r*w lanes and S = m*hr sublanes.

    Element (b, s, l) holds channel-group b, channel-in-group s//hr,
    row h = (s % hr)*r + l//w, column l % w.  The 3x3/-inf-padded max pool is
    done separably: 3-tap along W (lane rolls), then 3-tap along H (lane roll
    by w, wrapping into the adjacent sublane row for the edge lane groups).
    """
    x = x_ref[...]
    _, s_len, lanes = x.shape
    dtype = x.dtype
    if jnp.issubdtype(dtype, jnp.floating):
        neg = jnp.array(-jnp.inf, dtype=dtype)
    else:
        neg = jnp.array(jnp.iinfo(dtype).min, dtype=dtype)

    # Tiny masks: (1, S, L) — do NOT scale with the channel-block size B.
    lane = lax.broadcasted_iota(jnp.int32, (1, s_len, lanes), 2)
    col = lane % w if r > 1 else lane

    # ---- 3-tap max along W (lane axis), -inf outside each row's W segment ---
    wlo = jnp.where(col >= 1, pltpu.roll(x, shift=1, axis=2), neg)
    whi = jnp.where(col <= w - 2, pltpu.roll(x, shift=lanes - 1, axis=2), neg)
    xw = jnp.maximum(jnp.maximum(wlo, whi), x)

    # ---- 3-tap max along H ---------------------------------------------------
    if r == 1 and hr == 1:
        pooled = xw                      # 1-pixel-tall planes: nothing above/below
    else:
        if hr > 1:
            srow = lax.broadcasted_iota(jnp.int32, (1, s_len, lanes), 1)
            g = srow % hr if s_len != hr else srow   # row-group within a channel
        if r > 1:
            lo_lane = pltpu.roll(xw, shift=w, axis=2)          # h-1, same sublane
            hi_lane = pltpu.roll(xw, shift=lanes - w, axis=2)  # h+1, same sublane
            if hr > 1:
                lo_fix = pltpu.roll(lo_lane, shift=1, axis=1)          # from s-1
                hi_fix = pltpu.roll(hi_lane, shift=s_len - 1, axis=1)  # from s+1
                lo = jnp.where(lane >= w, lo_lane,
                               jnp.where(g >= 1, lo_fix, neg))
                hi = jnp.where(lane < lanes - w, hi_lane,
                               jnp.where(g <= hr - 2, hi_fix, neg))
            else:
                lo = jnp.where(lane >= w, lo_lane, neg)
                hi = jnp.where(lane < lanes - w, hi_lane, neg)
        else:
            # W >= 128: H lives purely on the sublane axis.
            lo = jnp.where(g >= 1, pltpu.roll(xw, shift=1, axis=1), neg)
            hi = jnp.where(g <= hr - 2,
                           pltpu.roll(xw, shift=s_len - 1, axis=1), neg)
        pooled = jnp.maximum(jnp.maximum(lo, hi), xw)

    o_ref[...] = (pooled * init_ref[...]).astype(o_ref.dtype)


# ---------------------------------------------------------------------------
# Wrapper
# ---------------------------------------------------------------------------
def _chip_config():
    """Per-generation block-size / VMEM-limit / grid-split targets."""
    vmem_cap = 128 * 1024 * 1024
    kind = ""
    try:
        vmem_cap = int(pltpu.get_tpu_info().vmem_capacity_bytes)
    except Exception:
        pass
    try:
        kind = jax.devices()[0].device_kind.lower()
    except Exception:
        pass
    is_v7 = (vmem_cap <= 80 * 1024 * 1024) or ("v7" in kind) or ("7x" in kind)
    if is_v7:
        # v7x: 64 MiB VMEM/TC, 2 TCs -> modest blocks, even parallel grid >= 4.
        return {"block_bytes": 3 * 1024 * 1024,
                "vmem_limit": 48 * 1024 * 1024,
                "min_steps": 4}
    # v5e / v6e: 128 MiB VMEM, single TC -> bigger blocks, no forced split.
    return {"block_bytes": 6 * 1024 * 1024,
            "vmem_limit": 96 * 1024 * 1024,
            "min_steps": 1}


def _pick_row_fold(h, w):
    """Largest r | H with r*W <= 128 (rows packed onto the lane axis)."""
    if w >= 128:
        return 1
    for cand in range(min(max(1, 128 // w), h), 0, -1):
        if h % cand == 0:
            return cand
    return 1


def _pick_channel_fold(nc, hr):
    """Smallest divisor m of NC making the sublane extent m*hr a multiple of 8
    (dense (8,128) tiles); fall back to >= 8, else all channels."""
    fallback = None
    for m in range(1, nc + 1):
        if nc % m:
            continue
        if (m * hr) % 8 == 0:
            return m
        if fallback is None and m * hr >= 8:
            fallback = m
    return fallback if fallback is not None else nc


def max_pool_matmul_layer(x, initial_input):
    """x, initial_input: (N, C, H, W). Returns maxpool3x3(s=1, p=1)(x) * initial_input."""
    assert x.shape == initial_input.shape
    N, C, H, W = x.shape
    NC = N * C
    dtype = x.dtype
    itemsize = jnp.dtype(dtype).itemsize
    cfg = _chip_config()

    # Free reshapes (flat order preserved): (N,C,H,W) -> (NC/m, m*(H/r), r*W).
    r = _pick_row_fold(H, W)
    hr = H // r
    lanes = r * W
    m = _pick_channel_fold(NC, hr)
    S = m * hr
    G = NC // m

    xv = x.reshape(G, S, lanes)
    pv = initial_input.reshape(G, S, lanes)

    # Channel-groups per block: fill the per-chip byte target, but keep at
    # least cfg["min_steps"] grid steps (v7x megacore) when possible.
    # TODO(synk): add an H-tiled (1-row halo) fallback for planes so large
    # that a single channel-group block exceeds the VMEM budget.
    group_bytes = S * lanes * itemsize
    b0 = max(1, min(G, cfg["block_bytes"] // max(1, group_bytes)))
    if cfg["min_steps"] > 1 and G > 1:
        b0 = min(b0, max(1, pl.cdiv(G, cfg["min_steps"])))
    grid = (pl.cdiv(G, b0),)   # ragged tail handled by Pallas (no jnp.pad)

    kernel = functools.partial(_pool_mul_kernel, r=r, w=W, hr=hr)
    out = pl.pallas_call(
        kernel,
        out_shape=jax.ShapeDtypeStruct((G, S, lanes), dtype),
        grid_spec=pltpu.PrefetchScalarGridSpec(
            num_scalar_prefetch=0,
            grid=grid,
            in_specs=[pl.BlockSpec((b0, S, lanes), lambda i: (i, 0, 0)),
                      pl.BlockSpec((b0, S, lanes), lambda i: (i, 0, 0))],
            out_specs=pl.BlockSpec((b0, S, lanes), lambda i: (i, 0, 0)),
        ),
        compiler_params=pltpu.CompilerParams(
            dimension_semantics=("parallel",),
            vmem_limit_bytes=cfg["vmem_limit"],
        ),
    )(xv, pv)
    return out.reshape(N, C, H, W)


# ---------------------------------------------------------------------------
# Reference + self-test
# ---------------------------------------------------------------------------
def _reference(x, initial_input):
    pooled = lax.reduce_window(
        x, -jnp.inf, lax.max,
        window_dimensions=(1, 1, 3, 3),
        window_strides=(1, 1, 1, 1),
        padding=((0, 0), (0, 0), (1, 1), (1, 1)))
    return pooled * initial_input


if __name__ == "__main__":
    key = jax.random.PRNGKey(0)
    k = jax.random.split(key, 6)

    # Module's natural test shape: lane-folded to dense (b, 8, 128) blocks.
    x1 = jax.random.normal(k[0], (2, 4, 16, 16), dtype=jnp.float32)
    p1 = jax.random.normal(k[1], (2, 4, 16, 16), dtype=jnp.float32)
    out1 = jax.block_until_ready(max_pool_matmul_layer(x1, p1))
    assert out1.shape == x1.shape
    assert jnp.allclose(out1, _reference(x1, p1), atol=1e-5, rtol=1e-5), \
        "mismatch (folded path, hr>1)"

    # Many channels, tiny planes: whole plane fits in one lane row (hr == 1).
    x2 = jax.random.normal(k[2], (1, 160, 8, 8), dtype=jnp.float32)
    p2 = jax.random.normal(k[3], (1, 160, 8, 8), dtype=jnp.float32)
    out2 = jax.block_until_ready(max_pool_matmul_layer(x2, p2))
    assert jnp.allclose(out2, _reference(x2, p2), atol=1e-5, rtol=1e-5), \
        "mismatch (hr == 1 path)"

    # Wide rows (W >= 128): natural layout is already lane-dense (r == 1).
    x3 = jax.random.normal(k[4], (1, 3, 16, 128), dtype=jnp.float32)
    p3 = jax.random.normal(k[5], (1, 3, 16, 128), dtype=jnp.float32)
    out3 = jax.block_until_ready(max_pool_matmul_layer(x3, p3))
    assert jnp.allclose(out3, _reference(x3, p3), atol=1e-5, rtol=1e-5), \
        "mismatch (r == 1 path)"

    print("KERNEL_OK")
</pallas_src>

<mosaic_0001>
module attributes {stable_mosaic.version = 11 : i64} {
  func.func @_pool_mul_kernel(%arg0: i32, %arg1: memref<2x8x128xf32, #tpu.memory_space<vmem>>, %arg2: memref<2x8x128xf32, #tpu.memory_space<vmem>>, %arg3: memref<2x8x128xf32, #tpu.memory_space<vmem>>) attributes {dimension_semantics = [#tpu.dimension_semantics<parallel>], iteration_bounds = array<i64: 1>, scalar_prefetch = 0 : i64, scratch_operands = 0 : i64, tpu.core_type = #tpu.core_type<tc>, window_params = [{transform_indices = @transform_0, window_bounds = array<i64: 2, 8, 128>}, {transform_indices = @transform_1, window_bounds = array<i64: 2, 8, 128>}, {transform_indices = @transform_2, window_bounds = array<i64: 2, 8, 128>}]} {
    %c0 = arith.constant 0 : index
    %c0_0 = arith.constant 0 : index
    %c0_1 = arith.constant 0 : index
    %0 = vector.load %arg1[%c0, %c0_0, %c0_1] : memref<2x8x128xf32, #tpu.memory_space<vmem>>, vector<2x8x128xf32>
    %1 = tpu.iota {dimensions = array<i32: 2>} : vector<1x8x128xi32>
    %c16_i32 = arith.constant 16 : i32
    %c0_i32 = arith.constant 0 : i32
    %2 = arith.cmpi eq, %c16_i32, %c0_i32 : i32
    %c1_i32 = arith.constant 1 : i32
    %3 = arith.select %2, %c1_i32, %c16_i32 : i32
    %4 = vector.broadcast %3 : i32 to vector<1x8x128xi32>
    %5 = arith.remsi %1, %4 : vector<1x8x128xi32>
    %c0_i32_2 = arith.constant 0 : i32
    %6 = vector.broadcast %c0_i32_2 : i32 to vector<1x8x128xi32>
    %7 = arith.cmpi ne, %5, %6 : vector<1x8x128xi32>
    %c0_i32_3 = arith.constant 0 : i32
    %8 = vector.broadcast %c0_i32_3 : i32 to vector<1x8x128xi32>
    %9 = arith.cmpi slt, %5, %8 : vector<1x8x128xi32>
    %c0_i32_4 = arith.constant 0 : i32
    %10 = arith.cmpi slt, %3, %c0_i32_4 : i32
    %11 = vector.broadcast %10 : i1 to vector<1x8x128xi1>
    %12 = vector.broadcast %11 : vector<1x8x128xi1> to vector<1x8x128xi1>
    %13 = arith.xori %9, %12 : vector<1x8x128xi1>
    %14 = arith.andi %13, %7 : vector<1x8x128xi1>
    %15 = vector.broadcast %3 : i32 to vector<1x8x128xi32>
    %16 = arith.addi %5, %15 : vector<1x8x128xi32>
    %17 = arith.select %14, %16, %5 : vector<1x8x128xi1>, vector<1x8x128xi32>
    %c1_i32_5 = arith.constant 1 : i32
    %18 = vector.broadcast %c1_i32_5 : i32 to vector<1x8x128xi32>
    %19 = arith.cmpi sge, %17, %18 : vector<1x8x128xi32>
    %c1_i32_6 = arith.constant 1 : i32
    %20 = tpu.dynamic_rotate %0 by %c1_i32_6 dim 2 : vector<2x8x128xf32>, i32 -> vector<2x8x128xf32>
    %cst = arith.constant 0xFF800000 : f32
    %21 = vector.shape_cast %19 : vector<1x8x128xi1> to vector<1x8x128xi1>
    %22 = vector.broadcast %21 : vector<1x8x128xi1> to vector<2x8x128xi1>
    %23 = vector.broadcast %cst : f32 to vector<2x8x128xf32>
    %24 = arith.select %22, %20, %23 : vector<2x8x128xi1>, vector<2x8x128xf32>
    %c14_i32 = arith.constant 14 : i32
    %25 = vector.broadcast %c14_i32 : i32 to vector<1x8x128xi32>
    %26 = arith.cmpi sle, %17, %25 : vector<1x8x128xi32>
    %c127_i32 = arith.constant 127 : i32
    %27 = tpu.dynamic_rotate %0 by %c127_i32 dim 2 : vector<2x8x128xf32>, i32 -> vector<2x8x128xf32>
    %cst_7 = arith.constant 0xFF800000 : f32
    %28 = vector.shape_cast %26 : vector<1x8x128xi1> to vector<1x8x128xi1>
    %29 = vector.broadcast %28 : vector<1x8x128xi1> to vector<2x8x128xi1>
    %30 = vector.broadcast %cst_7 : f32 to vector<2x8x128xf32>
    %31 = arith.select %29, %27, %30 : vector<2x8x128xi1>, vector<2x8x128xf32>
    %32 = arith.maximumf %24, %31 : vector<2x8x128xf32>
    %33 = arith.maximumf %32, %0 : vector<2x8x128xf32>
    %34 = tpu.iota {dimensions = array<i32: 1>} : vector<1x8x128xi32>
    %c2_i32 = arith.constant 2 : i32
    %c0_i32_8 = arith.constant 0 : i32
    %35 = arith.cmpi eq, %c2_i32, %c0_i32_8 : i32
    %c1_i32_9 = arith.constant 1 : i32
    %36 = arith.select %35, %c1_i32_9, %c2_i32 : i32
    %37 = vector.broadcast %36 : i32 to vector<1x8x128xi32>
    %38 = arith.remsi %34, %37 : vector<1x8x128xi32>
    %c0_i32_10 = arith.constant 0 : i32
    %39 = vector.broadcast %c0_i32_10 : i32 to vector<1x8x128xi32>
    %40 = arith.cmpi ne, %38, %39 : vector<1x8x128xi32>
    %c0_i32_11 = arith.constant 0 : i32
    %41 = vector.broadcast %c0_i32_11 : i32 to vector<1x8x128xi32>
    %42 = arith.cmpi slt, %38, %41 : vector<1x8x128xi32>
    %c0_i32_12 = arith.constant 0 : i32
    %43 = arith.cmpi slt, %36, %c0_i32_12 : i32
    %44 = vector.broadcast %43 : i1 to vector<1x8x128xi1>
    %45 = vector.broadcast %44 : vector<1x8x128xi1> to vector<1x8x128xi1>
    %46 = arith.xori %42, %45 : vector<1x8x128xi1>
    %47 = arith.andi %46, %40 : vector<1x8x128xi1>
    %48 = vector.broadcast %36 : i32 to vector<1x8x128xi32>
    %49 = arith.addi %38, %48 : vector<1x8x128xi32>
    %50 = arith.select %47, %49, %38 : vector<1x8x128xi1>, vector<1x8x128xi32>
    %c16_i32_13 = arith.constant 16 : i32
    %51 = tpu.dynamic_rotate %33 by %c16_i32_13 dim 2 : vector<2x8x128xf32>, i32 -> vector<2x8x128xf32>
    %c112_i32 = arith.constant 112 : i32
    %52 = tpu.dynamic_rotate %33 by %c112_i32 dim 2 : vector<2x8x128xf32>, i32 -> vector<2x8x128xf32>
    %c1_i32_14 = arith.constant 1 : i32
    %53 = tpu.dynamic_rotate %51 by %c1_i32_14 dim 1 : vector<2x8x128xf32>, i32 -> vector<2x8x128xf32>
    %c7_i32 = arith.constant 7 : i32
    %54 = tpu.dynamic_rotate %52 by %c7_i32 dim 1 : vector<2x8x128xf32>, i32 -> vector<2x8x128xf32>
    %c16_i32_15 = arith.constant 16 : i32
    %55 = vector.broadcast %c16_i32_15 : i32 to vector<1x8x128xi32>
    %56 = arith.cmpi sge, %1, %55 : vector<1x8x128xi32>
    %c1_i32_16 = arith.constant 1 : i32
    %57 = vector.broadcast %c1_i32_16 : i32 to vector<1x8x128xi32>
    %58 = arith.cmpi sge, %50, %57 : vector<1x8x128xi32>
    %cst_17 = arith.constant 0xFF800000 : f32
    %59 = vector.shape_cast %58 : vector<1x8x128xi1> to vector<1x8x128xi1>
    %60 = vector.broadcast %59 : vector<1x8x128xi1> to vector<2x8x128xi1>
    %61 = vector.broadcast %cst_17 : f32 to vector<2x8x128xf32>
    %62 = arith.select %60, %53, %61 : vector<2x8x128xi1>, vector<2x8x128xf32>
    %63 = vector.shape_cast %56 : vector<1x8x128xi1> to vector<1x8x128xi1>
    %64 = vector.broadcast %63 : vector<1x8x128xi1> to vector<2x8x128xi1>
    %65 = arith.select %64, %51, %62 : vector<2x8x128xi1>, vector<2x8x128xf32>
    %c112_i32_18 = arith.constant 112 : i32
    %66 = vector.broadcast %c112_i32_18 : i32 to vector<1x8x128xi32>
    %67 = arith.cmpi slt, %1, %66 : vector<1x8x128xi32>
    %c0_i32_19 = arith.constant 0 : i32
    %68 = vector.broadcast %c0_i32_19 : i32 to vector<1x8x128xi32>
    %69 = arith.cmpi sle, %50, %68 : vector<1x8x128xi32>
    %cst_20 = arith.constant 0xFF800000 : f32
    %70 = vector.shape_cast %69 : vector<1x8x128xi1> to vector<1x8x128xi1>
    %71 = vector.broadcast %70 : vector<1x8x128xi1> to vector<2x8x128xi1>
    %72 = vector.broadcast %cst_20 : f32 to vector<2x8x128xf32>
    %73 = arith.select %71, %54, %72 : vector<2x8x128xi1>, vector<2x8x128xf32>
    %74 = vector.shape_cast %67 : vector<1x8x128xi1> to vector<1x8x128xi1>
    %75 = vector.broadcast %74 : vector<1x8x128xi1> to vector<2x8x128xi1>
    %76 = arith.select %75, %52, %73 : vector<2x8x128xi1>, vector<2x8x128xf32>
    %77 = arith.maximumf %65, %76 : vector<2x8x128xf32>
    %78 = arith.maximumf %77, %33 : vector<2x8x128xf32>
    %c0_21 = arith.constant 0 : index
    %c0_22 = arith.constant 0 : index
    %c0_23 = arith.constant 0 : index
    %79 = vector.load %arg2[%c0_21, %c0_22, %c0_23] : memref<2x8x128xf32, #tpu.memory_space<vmem>>, vector<2x8x128xf32>
    %80 = arith.mulf %78, %79 : vector<2x8x128xf32>
    %c0_24 = arith.constant 0 : index
    %c0_25 = arith.constant 0 : index
    %c0_26 = arith.constant 0 : index
    %81 = vector.load %arg3[%c0_24, %c0_25, %c0_26] : memref<2x8x128xf32, #tpu.memory_space<vmem>>, vector<2x8x128xf32>
    tpu.vector_store %arg3[%c0_24, %c0_25, %c0_26], %80 {strides = array<i32>} : memref<2x8x128xf32, #tpu.memory_space<vmem>>, vector<2x8x128xf32>,
    return
  }
  func.func @transform_0(%arg0: i32) -> (i32, i32, i32) {
    %c0_i32 = arith.constant 0 : i32
    %c0_i32_0 = arith.constant 0 : i32
    %c0_i32_1 = arith.constant 0 : i32
    return %arg0, %c0_i32, %c0_i32_0 : i32, i32, i32
  }
  func.func @transform_1(%arg0: i32) -> (i32, i32, i32) {
    %c0_i32 = arith.constant 0 : i32
    %c0_i32_0 = arith.constant 0 : i32
    %c0_i32_1 = arith.constant 0 : i32
    return %arg0, %c0_i32, %c0_i32_0 : i32, i32, i32
  }
  func.func @transform_2(%arg0: i32) -> (i32, i32, i32) {
    %c0_i32 = arith.constant 0 : i32
    %c0_i32_0 = arith.constant 0 : i32
    %c0_i32_1 = arith.constant 0 : i32
    return %arg0, %c0_i32, %c0_i32_0 : i32, i32, i32
  }
}

</mosaic_0001>

<bundles_post_ra>
// kernel: tpu_custom_call.1
= control target key start
LH: loop header
LB: loop body
LE: loop exit
PB: predicated region body
PF: predicated region fallthrough
CT: control target
= control target key end

     0   :  { %7 = vsyncpa [#allocation3], 0  ;;  %s304_s0 = inlined_call_operand.hbm [shape: f32[2,8,128], index: 0, kind: input, shape index: {}]   ;;  %s305_s1 = inlined_call_operand.hbm [shape: f32[2,8,128], index: 1, kind: input, shape index: {}]   ;;  %s306_s2 = inlined_call_operand.hbm [shape: f32[2,8,128], index: 2, kind: output, shape index: {}]  }
   0x1   :  { %8 = vsyncpa [#allocation6], 0 }
   0x2   :  { %9 = vsyncpa [#allocation4], 0  ;;  %s233_s9 = smov [#allocation2]   ;;  %s161_s13 = scalar_lea.hbm %s304_s0, 256 }
   0x3   :  { %s15_s10 = sshll.u32 %s233_s9, 4  ;;  %p162_p0 = scmp.ne.s32.totalorder %s304_s0, %s161_s13  ;;  %s16_s10 = int_to_ptr.vmem [resolvable:$true] %s15_s10 }
   0x4   :  { %p165_p1 = scmp.lt.u32.totalorder %s161_s13, %s304_s0 }
   0x6   :  { %p167_p2 = pnand %p165_p1, %p162_p0 }
   0x8   :  { %170 = shalt.err (!%p167_p2)
}
   0x9   :  { %s171_s18 = scalar_lea.vmem %s16_s10, 256  ;;  %p176_p4 = scmp.lt.s32.totalorder %s16_s10, %s16_s10 }
   0xa   :  { %p172_p3 = scmp.ne.s32.totalorder %s16_s10, %s171_s18  ;;  %p177_p5 = scmp.lt.s32.totalorder %s171_s18, %s171_s18 }
   0xc   :  { %p178_p6 = por %p177_p5, %p176_p4 }
   0xe   :  { %p179_p7 = pnand %p178_p6, %p172_p3 }
  0x10   :  { %182 = shalt.err (!%p179_p7)
}
  0x11   :  { %s234_s19 = smov 128   ;;  %s235_s20 = smov 8  }
  0x12   :  { %21 = dma.hbm_to_vmem [thread:$0]  %s304_s0, 256, %s16_s10, [#allocation3], %s234_s19, %s234_s19, %s235_s20  }
  0x13   :  { %s236_s23 = smov [#allocation5]   ;;  %s183_s27 = scalar_lea.hbm %s305_s1, 256 }
  0x14   :  { %s27_s24 = sshll.u32 %s236_s23, 4  ;;  %p184_p8 = scmp.ne.s32.totalorder %s305_s1, %s183_s27  ;;  %s28_s24 = int_to_ptr.vmem [resolvable:$true] %s27_s24 }
  0x15   :  { %p187_p9 = scmp.lt.u32.totalorder %s183_s27, %s305_s1 }
  0x17   :  { %p189_p10 = pnand %p187_p9, %p184_p8 }
  0x19   :  { %192 = shalt.err (!%p189_p10)
}
  0x1a   :  { %s193_s4 = scalar_lea.vmem %s28_s24, 256  ;;  %p198_p12 = scmp.lt.s32.totalorder %s28_s24, %s28_s24 }
  0x1b   :  { %p194_p11 = scmp.ne.s32.totalorder %s28_s24, %s193_s4  ;;  %p199_p13 = scmp.lt.s32.totalorder %s193_s4, %s193_s4 }
  0x1d   :  { %p200_p0 = por %p199_p13, %p198_p12 }
  0x1f   :  { %p201_p1 = pnand %p200_p0, %p194_p11 }
  0x21   :  { %204 = shalt.err (!%p201_p1)
}
  0x22   :  { %33 = dma.hbm_to_vmem [thread:$0]  %s305_s1, 256, %s28_s24, [#allocation6], %s234_s19, %s234_s19, %s235_s20  }
  0x23   :  { %227 = dma.done.wait [#allocation3], 256  }
  0x24   :  { %228 = vsyncadd [#allocation3], 4294967040 }
  0x25   :  { %229 = dma.done.wait [#allocation6], 256  }
  0x26   :  { %230 = vsyncadd [#allocation6], 4294967040  ;;  %v40_v0 = vld [vmem:[#allocation2] sm:$0xff]  ;;  %s237_s6 = smov 127   ;;  %s238_s7 = smov 1   ;;  %v41_v1 = vld [vmem:[#allocation2 + $0x8] sm:$0xff]  ;;  %v42_v2 = vlaneseq }
  0x27   :  { %66 = vrot.lane.b32.xlu1 %v40_v0, %s237_s6  ;;  %57 = vrot.lane.b32.xlu0 %v40_v0, %s238_s7  ;;  %s239_s1 = smov 16   ;;  %s240_s8 = smov 112   ;;  %v128_v33 = vld [vmem:[#allocation5] sm:$0xff]  ;;  %v129_v40 = vld [vmem:[#allocation5 + $0x8] sm:$0xff] }
  0x28   :  { %v43_v3 = vand.u32 127, %v42_v2  ;;  %v79_v17 = vshrl.u32 %v42_v2, 7  ;;  %s241_s9 = smov [#allocation7]  }
  0x29   :  { %s139_s10 = sshll.u32 %s241_s9, 4  ;;  %s140_s10 = int_to_ptr.vmem [resolvable:$true] %s139_s10 }
  0x2a   :  { %v48_v4 = vand.u32 15, %v43_v3  ;;  %v84_v18 = vand.u32 1, %v79_v17  ;;  %vm104_vm3 = vcmp.ge.s32.totalorder %v43_v3, 16  ;;  %vm114_vm5 = vcmp.lt.s32.totalorder %v43_v3, 112  ;;  %s205_s11 = scalar_lea.vmem %s140_s10, 256  ;;  %p210_p3 = scmp.lt.s32.totalorder %s140_s10, %s140_s10 }
  0x2b   :  { %68 = vrot.lane.b32.xlu1 %v41_v1, %s237_s6  ;;  %59 = vrot.lane.b32.xlu0 %v41_v1, %s238_s7  ;;  %p206_p2 = scmp.ne.s32.totalorder %s140_s10, %s205_s11  ;;  %p211_p4 = scmp.lt.s32.totalorder %s205_s11, %s205_s11 }
  0x2c   :  { %vm65_vm0 = vcmp.le.s32.totalorder %v48_v4, 14  ;;  %vm56_vm1 = vcmp.ge.s32.totalorder %v48_v4, 1  ;;  %vm105_vm2 = vcmp.ge.s32.totalorder %v84_v18, 1  ;;  %vm115_vm4 = vcmp.le.s32.totalorder %v84_v18, 0 }
  0x2d   :  { %p212_p5 = por %p211_p4, %p210_p3 }
  0x2f   :  { %p213_p6 = pnand %p212_p5, %p206_p2 }
  0x99   :  { %v67_v5 = vpop.permute.xlu1 %66  ;;  %v58_v6 = vpop.permute.xlu0 %57 }
  0x9a   :  { %v72_v7 = vsel %vm65_vm0, %v67_v5, -inf  ;;  %v63_v8 = vsel %vm56_vm1, %v58_v6, -inf }
  0x9b   :  { %v74_v9 = vmax.f32 %v63_v8, %v72_v7 }
  0x9d   :  { %v76_v10 = vmax.f32 %v74_v9, %v40_v0  ;;  %v69_v11 = vpop.permute.xlu1 %68  ;;  %v60_v12 = vpop.permute.xlu0 %59 }
  0x9e   :  { %v73_v13 = vsel %vm65_vm0, %v69_v11, -inf  ;;  %v64_v14 = vsel %vm56_vm1, %v60_v12, -inf }
  0x9f   :  { %v75_v15 = vmax.f32 %v64_v14, %v73_v13  ;;  %92 = vrot.lane.b32.xlu0 %v76_v10, %s239_s1 }
  0xa1   :  { %v77_v16 = vmax.f32 %v75_v15, %v41_v1 }
  0xa3   :  { %96 = vrot.lane.b32.xlu0 %v76_v10, %s240_s8  ;;  %94 = vrot.lane.b32.xlu1 %v77_v16, %s239_s1 }
  0xa7   :  { %98 = vrot.lane.b32.xlu1 %v77_v16, %s240_s8 }
 0x111   :  { %v93_v19 = vpop.permute.xlu0 %92 }
 0x112   :  { %v100_v20 = vrot.slane %v93_v19, 7 }
 0x114   :  { %v108_v23 = vsel %vm105_vm2, %v100_v20, -inf }
 0x115   :  { %v95_v21 = vpop.permute.xlu1 %94  ;;  %v97_v22 = vpop.permute.xlu0 %96  ;;  %v112_v27 = vsel %vm104_vm3, %v93_v19, %v108_v23 }
 0x116   :  { %v101_v24 = vrot.slane %v95_v21, 7  ;;  %v102_v25 = vrot.slane %v97_v22, 1 }
 0x118   :  { %v118_v26 = vsel %vm115_vm4, %v102_v25, -inf  ;;  %v109_v30 = vsel %vm105_vm2, %v101_v24, -inf }
 0x119   :  { %v122_v28 = vsel %vm114_vm5, %v97_v22, %v118_v26  ;;  %v99_v29 = vpop.permute.xlu1 %98  ;;  %v113_v36 = vsel %vm104_vm3, %v95_v21, %v109_v30 }
 0x11a   :  { %v124_v31 = vmax.f32 %v112_v27, %v122_v28  ;;  %v103_v32 = vrot.slane %v99_v29, 1 }
 0x11c   :  { %v126_v34 = vmax.f32 %v124_v31, %v76_v10  ;;  %v119_v35 = vsel %vm115_vm4, %v103_v32, -inf }
 0x11d   :  { %v123_v37 = vsel %vm114_vm5, %v99_v29, %v119_v35 }
 0x11e   :  { %v125_v38 = vmax.f32 %v113_v36, %v123_v37  ;;  %v130_v39 = vmul.f32 %v128_v33, %v126_v34 }
 0x120   :  { %v127_v41 = vmax.f32 %v125_v38, %v77_v16  ;;  %132 = vst [vmem:[#allocation7] sm:$0xff] %v130_v39 }
 0x122   :  { %v131_v42 = vmul.f32 %v129_v40, %v127_v41 }
 0x124   :  { %133 = vst [vmem:[#allocation7 + $0x8] sm:$0xff] %v131_v42 }
 0x125   :  { %216 = shalt.err (!%p213_p6)
}
 0x126   :  { %s217_s14 = scalar_lea.hbm %s306_s2, 256 }
 0x127   :  { %p218_p7 = scmp.ne.s32.totalorder %s306_s2, %s217_s14  ;;  %p221_p8 = scmp.lt.u32.totalorder %s217_s14, %s306_s2 }
 0x129   :  { %p223_p9 = pnand %p221_p8, %p218_p7 }
 0x12b   :  { %226 = shalt.err (!%p223_p9)
}
 0x12c   :  { %145 = dma.vmem_to_hbm [thread:$0]  %s140_s10, 256, %s306_s2, [#allocation4], %s234_s19, %s234_s19, %s235_s20  }
 0x12d   :  { %231 = dma.done.wait [#allocation4], 256  }
 0x12e   :  { %232 = vsyncadd [#allocation4], 4294967040 }
 0x12f   :  { %149 = vsyncpa [#allocation3], 1 }
 0x130   :  { %150 = vsyncpa [#allocation6], 1 }
 0x131   :  { %151 = vsyncpa [#allocation4], 1 }

</bundles_post_ra>
